<compile_context>
chip_gen: v7x
topology: tpu7x:2x2x1
jax: 0.10.0
libtpu: 0.0.40
codegen_flags: <defaults>
</compile_context>

<pallas_src>
import jax
import jax.numpy as jnp
from jax.experimental import pallas as pl
from jax.experimental.pallas import tpu as pltpu


def _round_up(x, m):
    return ((x + m - 1) // m) * m


def _disc_mlp_kernel(x_ref, w1_ref, b1_ref, w2_ref, b2_ref, w3_ref, b3_ref, o_ref):
    """Fused MLP tile: Linear -> LeakyReLU(0.2) -> Linear -> LeakyReLU(0.2) -> Linear.

    x_ref:  (TILE_M, pacdim)  bf16
    w1_ref: (pacdim, H1p)     bf16     b1_ref: (1, H1p) f32
    w2_ref: (H1p, H2p)        bf16     b2_ref: (1, H2p) f32
    w3_ref: (1, H2p)          f32      b3_ref: (1, 1)   f32
    o_ref:  (TILE_M, 1)       f32
    """
    neg_slope = jnp.float32(0.2)

    x = x_ref[...]                                            # bf16 tile

    # Layer 1: bf16 matmul on MXU, f32 accumulation; bias + LeakyReLU in f32.
    h = jnp.dot(x, w1_ref[...], preferred_element_type=jnp.float32) + b1_ref[...]
    h = jnp.where(h > 0, h, neg_slope * h)                    # LeakyReLU(0.2)
    # TODO(synk): Dropout(0.5) is a training-time stochastic mask; treated as
    # identity here (inference / eval-mode semantics).

    # Layer 2.
    h = jnp.dot(h.astype(jnp.bfloat16), w2_ref[...],
                preferred_element_type=jnp.float32) + b2_ref[...]
    h = jnp.where(h > 0, h, neg_slope * h)                    # LeakyReLU(0.2)

    # Layer 3 (N=1): VPU multiply + lane reduction instead of a degenerate
    # 1-column MXU matmul.
    out = jnp.sum(h * w3_ref[...], axis=-1, keepdims=True) + b3_ref[...]
    o_ref[...] = out.astype(o_ref.dtype)


def init_discriminator_params(key, input_dim, discriminator_dim, pac=10):
    """Deterministic parameter init mirroring torch.nn.Linear default init."""
    dims = [input_dim * pac] + list(discriminator_dim) + [1]
    params = []
    for i in range(len(dims) - 1):
        key, kw, kb = jax.random.split(key, 3)
        fan_in = dims[i]
        bound = 1.0 / (fan_in ** 0.5)
        w = jax.random.uniform(kw, (dims[i], dims[i + 1]), jnp.float32, -bound, bound)
        b = jax.random.uniform(kb, (1, dims[i + 1]), jnp.float32, -bound, bound)
        params.append((w, b))
    return params


def _prepare_params(params):
    """Pad hidden widths to 128 lanes and cast matmul weights to bf16."""
    (w1, b1), (w2, b2), (w3, b3) = params
    k, h1 = w1.shape
    _, h2 = w2.shape
    h1p = _round_up(h1, 128)
    h2p = _round_up(h2, 128)

    w1p = jnp.zeros((k, h1p), jnp.bfloat16).at[:, :h1].set(w1.astype(jnp.bfloat16))
    b1p = jnp.zeros((1, h1p), jnp.float32).at[:, :h1].set(b1)
    w2p = jnp.zeros((h1p, h2p), jnp.bfloat16).at[:h1, :h2].set(w2.astype(jnp.bfloat16))
    b2p = jnp.zeros((1, h2p), jnp.float32).at[:, :h2].set(b2)
    # Final layer as a (1, H2p) f32 row used by the VPU/XLU reduction.
    w3p = jnp.zeros((1, h2p), jnp.float32).at[:, :h2].set(w3.reshape(1, -1))
    b3p = b3.reshape(1, 1).astype(jnp.float32)
    return w1p, b1p, w2p, b2p, w3p, b3p


def discriminator_forward(x, params, pac=10):
    """Equivalent of Discriminator.forward(input_) in eval mode."""
    batch, input_dim = x.shape
    assert batch % pac == 0, "batch must be divisible by pac"
    pacdim = input_dim * pac
    x_packed = x.reshape(batch // pac, pacdim)        # == input_.view(-1, pacdim)
    rows = x_packed.shape[0]

    w1p, b1p, w2p, b2p, w3p, b3p = _prepare_params(params)

    # Row tile: up to 256 (MXU-height friendly, amortizes per-grid-step
    # overhead); otherwise a multiple of 16 (bf16 sublane packing).  Pad rows
    # with zeros; padded rows are sliced off afterwards.  VMEM footprint stays
    # tiny: x tile 256 x pacdim bf16 plus ~100 KiB of resident weights.
    tile_m = min(256, _round_up(rows, 16))
    rows_p = _round_up(rows, tile_m)
    x_pad = jnp.zeros((rows_p, pacdim), jnp.bfloat16).at[:rows].set(
        x_packed.astype(jnp.bfloat16))

    grid = (rows_p // tile_m,)

    # Weights here are tiny (<< VMEM).  For a very large production pacdim the
    # first matmul would additionally need a K-axis grid with a VMEM f32
    # accumulator; not needed at CTGAN sizes.
    out = pl.pallas_call(
        _disc_mlp_kernel,
        out_shape=jax.ShapeDtypeStruct((rows_p, 1), jnp.float32),
        grid=grid,
        in_specs=[
            pl.BlockSpec((tile_m, pacdim), lambda i: (i, 0)),   # x: tiled over rows
            pl.BlockSpec(w1p.shape, lambda i: (0, 0)),          # weights stay resident
            pl.BlockSpec(b1p.shape, lambda i: (0, 0)),
            pl.BlockSpec(w2p.shape, lambda i: (0, 0)),
            pl.BlockSpec(b2p.shape, lambda i: (0, 0)),
            pl.BlockSpec(w3p.shape, lambda i: (0, 0)),
            pl.BlockSpec(b3p.shape, lambda i: (0, 0)),
        ],
        out_specs=pl.BlockSpec((tile_m, 1), lambda i: (i, 0)),
        compiler_params=pltpu.CompilerParams(
            dimension_semantics=("parallel",)),
    )(x_pad, w1p, b1p, w2p, b2p, w3p, b3p)

    return out[:rows]


def _reference_forward(x, params, pac=10):
    """Pure-JAX f32 reference (eval mode) for a sanity check."""
    batch, input_dim = x.shape
    h = x.reshape(batch // pac, input_dim * pac)
    (w1, b1), (w2, b2), (w3, b3) = params
    h = jnp.dot(h, w1) + b1
    h = jnp.where(h > 0, h, 0.2 * h)
    h = jnp.dot(h, w2) + b2
    h = jnp.where(h > 0, h, 0.2 * h)
    return jnp.dot(h, w3) + b3


if __name__ == "__main__":
    # Small shapes consistent with the module: pac=10, input_dim=16,
    # discriminator_dim=(32, 32), batch = 2 * pac = 20.
    pac = 10
    input_dim = 16
    discriminator_dim = (32, 32)
    batch = 2 * pac

    key = jax.random.PRNGKey(0)
    key, kx = jax.random.split(key)
    x = jax.random.normal(kx, (batch, input_dim), dtype=jnp.float32)

    params = init_discriminator_params(key, input_dim, discriminator_dim, pac=pac)

    y = discriminator_forward(x, params, pac=pac)
    y = jax.block_until_ready(y)

    assert y.shape == (batch // pac, 1)
    assert y.dtype == jnp.float32

    # Loose tolerance: kernel uses bf16 inputs with f32 accumulation.
    y_ref = _reference_forward(x, params, pac=pac)
    assert jnp.allclose(y, y_ref, rtol=0.1, atol=0.1), (y, y_ref)

    print("KERNEL_OK")
</pallas_src>

<mosaic_0001>
module attributes {stable_mosaic.version = 11 : i64} {
  func.func @_disc_mlp_kernel(%arg0: i32, %arg1: memref<16x160xbf16, #tpu.memory_space<vmem>>, %arg2: memref<160x128xbf16, #tpu.memory_space<vmem>>, %arg3: memref<1x128xf32, #tpu.memory_space<vmem>>, %arg4: memref<128x128xbf16, #tpu.memory_space<vmem>>, %arg5: memref<1x128xf32, #tpu.memory_space<vmem>>, %arg6: memref<1x128xf32, #tpu.memory_space<vmem>>, %arg7: memref<1x1xf32, #tpu.memory_space<vmem>>, %arg8: memref<16x1xf32, #tpu.memory_space<vmem>>) attributes {dimension_semantics = [#tpu.dimension_semantics<parallel>], iteration_bounds = array<i64: 1>, scalar_prefetch = 0 : i64, scratch_operands = 0 : i64, tpu.core_type = #tpu.core_type<tc>, window_params = [{transform_indices = @transform_0, window_bounds = array<i64: 16, 160>}, {pipeline_mode = #tpu.pipeline_mode<synchronous>, transform_indices = @transform_1, window_bounds = array<i64: 160, 128>}, {pipeline_mode = #tpu.pipeline_mode<synchronous>, transform_indices = @transform_2, window_bounds = array<i64: 1, 128>}, {pipeline_mode = #tpu.pipeline_mode<synchronous>, transform_indices = @transform_3, window_bounds = array<i64: 128, 128>}, {pipeline_mode = #tpu.pipeline_mode<synchronous>, transform_indices = @transform_4, window_bounds = array<i64: 1, 128>}, {pipeline_mode = #tpu.pipeline_mode<synchronous>, transform_indices = @transform_5, window_bounds = array<i64: 1, 128>}, {pipeline_mode = #tpu.pipeline_mode<synchronous>, transform_indices = @transform_6, window_bounds = array<i64: 1, 1>}, {transform_indices = @transform_7, window_bounds = array<i64: 16, 1>}]} {
    %c0 = arith.constant 0 : index
    %c0_0 = arith.constant 0 : index
    %0 = vector.load %arg1[%c0, %c0_0] : memref<16x160xbf16, #tpu.memory_space<vmem>>, vector<16x160xbf16>
    %c0_1 = arith.constant 0 : index
    %c0_2 = arith.constant 0 : index
    %1 = vector.load %arg2[%c0_1, %c0_2] : memref<160x128xbf16, #tpu.memory_space<vmem>>, vector<160x128xbf16>
    %cst = arith.constant dense<0.000000e+00> : vector<16x128xf32>
    %2 = tpu.matmul %0, %1, %cst {dimension_numbers = #tpu.dot_dimension_numbers<[1], [0], [0], [1], [0, 0, 1, 1], [], []>} : vector<16x160xbf16>, vector<160x128xbf16>, vector<16x128xf32> -> vector<16x128xf32>
    %c0_3 = arith.constant 0 : index
    %c0_4 = arith.constant 0 : index
    %3 = vector.load %arg3[%c0_3, %c0_4] : memref<1x128xf32, #tpu.memory_space<vmem>>, vector<1x128xf32>
    %4 = vector.broadcast %3 : vector<1x128xf32> to vector<16x128xf32>
    %5 = arith.addf %2, %4 : vector<16x128xf32>
    %cst_5 = arith.constant 0.000000e+00 : f32
    %6 = vector.broadcast %cst_5 : f32 to vector<16x128xf32>
    %7 = arith.cmpf ogt, %5, %6 : vector<16x128xf32>
    %cst_6 = arith.constant 2.000000e-01 : f32
    %8 = vector.broadcast %cst_6 : f32 to vector<16x128xf32>
    %9 = arith.mulf %8, %5 : vector<16x128xf32>
    %10 = arith.select %7, %5, %9 : vector<16x128xi1>, vector<16x128xf32>
    %11 = arith.truncf %10 : vector<16x128xf32> to vector<16x128xbf16>
    %c0_7 = arith.constant 0 : index
    %c0_8 = arith.constant 0 : index
    %12 = vector.load %arg4[%c0_7, %c0_8] : memref<128x128xbf16, #tpu.memory_space<vmem>>, vector<128x128xbf16>
    %cst_9 = arith.constant dense<0.000000e+00> : vector<16x128xf32>
    %13 = tpu.matmul %11, %12, %cst_9 {dimension_numbers = #tpu.dot_dimension_numbers<[1], [0], [0], [1], [0, 0, 1, 1], [], []>} : vector<16x128xbf16>, vector<128x128xbf16>, vector<16x128xf32> -> vector<16x128xf32>
    %c0_10 = arith.constant 0 : index
    %c0_11 = arith.constant 0 : index
    %14 = vector.load %arg5[%c0_10, %c0_11] : memref<1x128xf32, #tpu.memory_space<vmem>>, vector<1x128xf32>
    %15 = vector.broadcast %14 : vector<1x128xf32> to vector<16x128xf32>
    %16 = arith.addf %13, %15 : vector<16x128xf32>
    %cst_12 = arith.constant 0.000000e+00 : f32
    %17 = vector.broadcast %cst_12 : f32 to vector<16x128xf32>
    %18 = arith.cmpf ogt, %16, %17 : vector<16x128xf32>
    %cst_13 = arith.constant 2.000000e-01 : f32
    %19 = vector.broadcast %cst_13 : f32 to vector<16x128xf32>
    %20 = arith.mulf %19, %16 : vector<16x128xf32>
    %21 = arith.select %18, %16, %20 : vector<16x128xi1>, vector<16x128xf32>
    %c0_14 = arith.constant 0 : index
    %c0_15 = arith.constant 0 : index
    %22 = vector.load %arg6[%c0_14, %c0_15] : memref<1x128xf32, #tpu.memory_space<vmem>>, vector<1x128xf32>
    %23 = vector.broadcast %22 : vector<1x128xf32> to vector<16x128xf32>
    %24 = arith.mulf %21, %23 : vector<16x128xf32>
    %cst_16 = arith.constant dense<0.000000e+00> : vector<16xf32>
    %25 = vector.multi_reduction <add>, %24, %cst_16 [1] : vector<16x128xf32> to vector<16xf32>
    %26 = vector.shape_cast %25 : vector<16xf32> to vector<16x1xf32>
    %c0_17 = arith.constant 0 : index
    %c0_18 = arith.constant 0 : index
    %27 = vector.load %arg7[%c0_17, %c0_18] : memref<1x1xf32, #tpu.memory_space<vmem>>, vector<1x1xf32>
    %28 = vector.broadcast %27 : vector<1x1xf32> to vector<16x1xf32>
    %29 = arith.addf %26, %28 : vector<16x1xf32>
    %c0_19 = arith.constant 0 : index
    %c0_20 = arith.constant 0 : index
    %30 = vector.load %arg8[%c0_19, %c0_20] : memref<16x1xf32, #tpu.memory_space<vmem>>, vector<16x1xf32>
    tpu.vector_store %arg8[%c0_19, %c0_20], %29 {strides = array<i32>} : memref<16x1xf32, #tpu.memory_space<vmem>>, vector<16x1xf32>,
    return
  }
  func.func @transform_0(%arg0: i32) -> (i32, i32) {
    %c0_i32 = arith.constant 0 : i32
    %c0_i32_0 = arith.constant 0 : i32
    return %arg0, %c0_i32 : i32, i32
  }
  func.func @transform_1(%arg0: i32) -> (i32, i32) {
    %c0_i32 = arith.constant 0 : i32
    %c0_i32_0 = arith.constant 0 : i32
    %c0_i32_1 = arith.constant 0 : i32
    return %c0_i32, %c0_i32_0 : i32, i32
  }
  func.func @transform_2(%arg0: i32) -> (i32, i32) {
    %c0_i32 = arith.constant 0 : i32
    %c0_i32_0 = arith.constant 0 : i32
    %c0_i32_1 = arith.constant 0 : i32
    return %c0_i32, %c0_i32_0 : i32, i32
  }
  func.func @transform_3(%arg0: i32) -> (i32, i32) {
    %c0_i32 = arith.constant 0 : i32
    %c0_i32_0 = arith.constant 0 : i32
    %c0_i32_1 = arith.constant 0 : i32
    return %c0_i32, %c0_i32_0 : i32, i32
  }
  func.func @transform_4(%arg0: i32) -> (i32, i32) {
    %c0_i32 = arith.constant 0 : i32
    %c0_i32_0 = arith.constant 0 : i32
    %c0_i32_1 = arith.constant 0 : i32
    return %c0_i32, %c0_i32_0 : i32, i32
  }
  func.func @transform_5(%arg0: i32) -> (i32, i32) {
    %c0_i32 = arith.constant 0 : i32
    %c0_i32_0 = arith.constant 0 : i32
    %c0_i32_1 = arith.constant 0 : i32
    return %c0_i32, %c0_i32_0 : i32, i32
  }
  func.func @transform_6(%arg0: i32) -> (i32, i32) {
    %c0_i32 = arith.constant 0 : i32
    %c0_i32_0 = arith.constant 0 : i32
    %c0_i32_1 = arith.constant 0 : i32
    return %c0_i32, %c0_i32_0 : i32, i32
  }
  func.func @transform_7(%arg0: i32) -> (i32, i32) {
    %c0_i32 = arith.constant 0 : i32
    %c0_i32_0 = arith.constant 0 : i32
    return %arg0, %c0_i32 : i32, i32
  }
}

</mosaic_0001>

<bundles_post_ra>
// kernel: tpu_custom_call.1
= control target key start
LH: loop header
LB: loop body
LE: loop exit
PB: predicated region body
PF: predicated region fallthrough
CT: control target
= control target key end

     0   :  { %s634_s0 = inlined_call_operand.hbm [shape: bf16[16,160], index: 0, kind: input, shape index: {}]   ;;  %s635_s1 = inlined_call_operand.hbm [shape: bf16[160,128], index: 1, kind: input, shape index: {}]   ;;  %s636_s2 = inlined_call_operand.vmem [shape: f32[1,128], index: 2, kind: input, shape index: {}]   ;;  %s637_s3 = inlined_call_operand.hbm [shape: bf16[128,128], index: 3, kind: input, shape index: {}]   ;;  %s638_s4 = inlined_call_operand.vmem [shape: f32[1,128], index: 4, kind: input, shape index: {}]   ;;  %s639_s5 = inlined_call_operand.vmem [shape: f32[1,128], index: 5, kind: input, shape index: {}]   ;;  %s640_s6 = inlined_call_operand.<no memory space> [shape: f32[1,1], index: 6, kind: input, shape index: {}]   ;;  %s641_s7 = inlined_call_operand.vmem [shape: f32[16,1], index: 7, kind: output, shape index: {}]  }
   0x1   :  { %v12_v0 = vstv %s640_s6 }
   0x2   :  { %13 = vst [vmem:[#allocation2] sm:$0x1] %v12_v0 }
   0x3   :  { %14 = vsyncpa [#allocation4], 0 }
   0x4   :  { %15 = vsyncpa [#allocation6], 0  ;;  %s524_s26 = smov [#allocation5]   ;;  %s454_s30 = scalar_lea.hbm %s635_s1, 1280 }
   0x5   :  { %s33_s27 = sshll.u32 %s524_s26, 4  ;;  %p455_p0 = scmp.ne.s32.totalorder %s635_s1, %s454_s30  ;;  %s34_s27 = int_to_ptr.vmem [resolvable:$true] %s33_s27 }
   0x6   :  { %p458_p1 = scmp.lt.u32.totalorder %s454_s30, %s635_s1 }
   0x8   :  { %p460_p2 = pnand %p458_p1, %p455_p0 }
   0xa   :  { %463 = shalt.err (!%p460_p2)
}
   0xb   :  { %s464_s6 = scalar_lea.vmem %s34_s27, 1280  ;;  %p469_p4 = scmp.lt.s32.totalorder %s34_s27, %s34_s27 }
   0xc   :  { %p465_p3 = scmp.ne.s32.totalorder %s34_s27, %s464_s6  ;;  %p470_p5 = scmp.lt.s32.totalorder %s464_s6, %s464_s6 }
   0xe   :  { %p471_p6 = por %p470_p5, %p469_p4 }
  0x10   :  { %p472_p7 = pnand %p471_p6, %p465_p3 }
  0x12   :  { %475 = shalt.err (!%p472_p7)
}
  0x13   :  { %s525_s12 = smov 64   ;;  %s526_s13 = smov 4  }
  0x14   :  { %39 = dma.hbm_to_vmem [thread:$0]  %s635_s1, 1280, %s34_s27, [#allocation6], %s525_s12, %s525_s12, %s526_s13  }
  0x15   :  { %s527_s16 = smov [#allocation3]   ;;  %s476_s20 = scalar_lea.hbm %s634_s0, 256 }
  0x16   :  { %s21_s17 = sshll.u32 %s527_s16, 4  ;;  %p477_p8 = scmp.ne.s32.totalorder %s634_s0, %s476_s20  ;;  %s22_s17 = int_to_ptr.vmem [resolvable:$true] %s21_s17 }
  0x17   :  { %p480_p9 = scmp.lt.u32.totalorder %s476_s20, %s634_s0 }
  0x19   :  { %p482_p10 = pnand %p480_p9, %p477_p8 }
  0x1b   :  { %485 = shalt.err (!%p482_p10)
}
  0x1c   :  { %s486_s25 = scalar_lea.vmem %s22_s17, 256  ;;  %p491_p12 = scmp.lt.s32.totalorder %s22_s17, %s22_s17 }
  0x1d   :  { %p487_p11 = scmp.ne.s32.totalorder %s22_s17, %s486_s25  ;;  %p492_p13 = scmp.lt.s32.totalorder %s486_s25, %s486_s25 }
  0x1f   :  { %p493_p0 = por %p492_p13, %p491_p12 }
  0x21   :  { %p494_p1 = pnand %p493_p0, %p487_p11 }
  0x23   :  { %497 = shalt.err (!%p494_p1)
}
  0x24   :  { %s528_s1 = smov 128   ;;  %s529_s26 = smov 8  }
  0x25   :  { %27 = dma.hbm_to_vmem [thread:$0]  %s634_s0, 256, %s22_s17, [#allocation4], %s528_s1, %s528_s1, %s529_s26  }
  0x26   :  { %s530_s29 = smov [#allocation7]   ;;  %s498_s10 = scalar_lea.hbm %s637_s3, 1024 }
  0x27   :  { %s47_s30 = sshll.u32 %s530_s29, 4  ;;  %p499_p2 = scmp.ne.s32.totalorder %s637_s3, %s498_s10  ;;  %s48_s30 = int_to_ptr.vmem [resolvable:$true] %s47_s30 }
  0x28   :  { %p502_p3 = scmp.lt.u32.totalorder %s498_s10, %s637_s3 }
  0x2a   :  { %p504_p4 = pnand %p502_p3, %p499_p2 }
  0x2c   :  { %507 = shalt.err (!%p504_p4)
}
  0x2d   :  { %s508_s16 = scalar_lea.vmem %s48_s30, 1024  ;;  %p513_p6 = scmp.lt.s32.totalorder %s48_s30, %s48_s30 }
  0x2e   :  { %p509_p5 = scmp.ne.s32.totalorder %s48_s30, %s508_s16  ;;  %p514_p7 = scmp.lt.s32.totalorder %s508_s16, %s508_s16 }
  0x30   :  { %p515_p8 = por %p514_p7, %p513_p6 }
  0x32   :  { %p516_p9 = pnand %p515_p8, %p509_p5 }
  0x34   :  { %519 = shalt.err (!%p516_p9)
}
  0x35   :  { %53 = dma.hbm_to_vmem [thread:$0]  %s637_s3, 1024, %s48_s30, [#allocation6], %s525_s12, %s525_s12, %s526_s13  }
  0x36   :  { %520 = dma.done.wait [#allocation4], 256  }
  0x37   :  { %521 = vsyncadd [#allocation4], 4294967040 }
  0x38   :  { %522 = dma.done.wait [#allocation6], 2304  }
  0x39   :  { %523 = vsyncadd [#allocation6], 4294964992  ;;  %v531_v1 = vmov 0   ;;  %v532_v2 = vmov 0.0   ;;  %v433_v3 = vld [vmem:[#allocation5] sm:$0xff]   ;;  %v434_v4 = vld [vmem:[#allocation5 + $0x8] sm:$0xff]  }
  0x3a   :  { %172 = vmatprep.subr.bf16.mxu0 %v531_v1  ;;  %403 = vmatprep.subr.bf16.mxu1 %v532_v2  ;;  %v435_v5 = vld [vmem:[#allocation5 + $0x10] sm:$0xff]   ;;  %v436_v6 = vld [vmem:[#allocation5 + $0x18] sm:$0xff]   ;;  %vm168_vm0 = vcmask 261120   ;;  %v437_v9 = vld [vmem:[#allocation5 + $0x20] sm:$0xff]   ;;  %vm533_vm1 = vmmov 0   ;;  %vm360_vm6 = vcmask 7168  }
  0x3b   :  { %173 = vmatpush1.bf16.msra.mxu0 %v433_v3  ;;  %v445_v7 = vld [vmem:[#allocation3 + $0x4] ss:$8 sps:$4 sm:$0xff]   ;;  %v438_v11 = vld [vmem:[#allocation5 + $0x28] sm:$0xff]   ;;  %v448_v12 = vld [vmem:[#allocation7 + $0x10] sm:$0xff]   ;;  %419 = vmatprep.mubr.msk.bf16.mxu1 %vm533_vm1, %v532_v2 }
  0x3c   :  { %174 = vmatprep.subr.bf16.mxu0 %v531_v1  ;;  %v446_v8 = vld [vmem:[#allocation7] sm:$0xff]   ;;  %382 = vmatprep.mubr.msk.bf16.mxu0 %vm168_vm0, %v445_v7  ;;  %v447_v10 = vld [vmem:[#allocation7 + $0x8] sm:$0xff]   ;;  %v449_v14 = vld [vmem:[#allocation7 + $0x18] sm:$0xff]  }
  0x3d   :  { %404 = vmatpush3.bf16.msra.mxu1 %v446_v8  ;;  %v439_v13 = vld [vmem:[#allocation5 + $0x30] sm:$0xff]   ;;  %v440_v15 = vld [vmem:[#allocation5 + $0x38] sm:$0xff]   ;;  %v441_v17 = vld [vmem:[#allocation5 + $0x40] sm:$0xff]  }
  0x3e   :  { %405 = vmatprep.subr.bf16.mxu1 %v532_v2  ;;  %v450_v16 = vld [vmem:[#allocation7 + $0x20] sm:$0xff]   ;;  %v451_v18 = vld [vmem:[#allocation7 + $0x28] sm:$0xff]   ;;  %v442_v19 = vld [vmem:[#allocation5 + $0x48] sm:$0xff]  }
  0x3f   :  { %175 = vmatpush1.bf16.msra.mxu0 %v434_v4  ;;  %v443_v20 = vld [vmem:[#allocation3] ss:$8 sps:$4 sm:$0xff]   ;;  %v452_v21 = vld [vmem:[#allocation7 + $0x30] sm:$0xff]   ;;  %v453_v22 = vld [vmem:[#allocation7 + $0x38] sm:$0xff]  }
  0x40   :  { %176 = vmatprep.subr.bf16.mxu0 %v531_v1  ;;  %v369_v23 = vld [vmem:[%s636_s2] ss:$0 sm:$0xff] }
  0x41   :  { %406 = vmatpush3.bf16.msra.mxu1 %v447_v10  ;;  %v383_v35 = vld [vmem:[%s638_s4] ss:$0 sm:$0xff] }
  0x42   :  { %407 = vmatprep.subr.bf16.mxu1 %v532_v2  ;;  %v392_v43 = vld [vmem:[%s639_s5] ss:$0 sm:$0xff] }
  0x43   :  { %177 = vmatpush1.bf16.msra.mxu0 %v435_v5  ;;  %v393_v49 = vld [vmem:[#allocation2] ss:$0 sm:$0xff] }
  0x44   :  { %178 = vmatprep.subr.bf16.mxu0 %v531_v1 }
  0x45   :  { %408 = vmatpush3.bf16.msra.mxu1 %v448_v12 }
  0x46   :  { %409 = vmatprep.subr.bf16.mxu1 %v532_v2 }
  0x47   :  { %179 = vmatpush1.bf16.msra.mxu0 %v436_v6 }
  0x48   :  { %180 = vmatprep.subr.bf16.mxu0 %v531_v1 }
  0x49   :  { %410 = vmatpush3.bf16.msra.mxu1 %v449_v14 }
  0x4a   :  { %411 = vmatprep.subr.bf16.mxu1 %v532_v2 }
  0x4b   :  { %181 = vmatpush1.bf16.msra.mxu0 %v437_v9 }
  0x4c   :  { %182 = vmatprep.subr.bf16.mxu0 %v531_v1 }
  0x4d   :  { %412 = vmatpush3.bf16.msra.mxu1 %v450_v16 }
  0x4e   :  { %413 = vmatprep.subr.bf16.mxu1 %v532_v2 }
  0x4f   :  { %183 = vmatpush1.bf16.msra.mxu0 %v438_v11 }
  0x50   :  { %184 = vmatprep.subr.bf16.mxu0 %v531_v1 }
  0x51   :  { %414 = vmatpush3.bf16.msra.mxu1 %v451_v18 }
  0x52   :  { %415 = vmatprep.subr.bf16.mxu1 %v532_v2 }
  0x53   :  { %185 = vmatpush1.bf16.msra.mxu0 %v439_v13 }
  0x54   :  { %186 = vmatprep.subr.bf16.mxu0 %v531_v1 }
  0x55   :  { %416 = vmatpush3.bf16.msra.mxu1 %v452_v21 }
  0x56   :  { %417 = vmatprep.subr.bf16.mxu1 %v532_v2 }
  0x57   :  { %187 = vmatpush1.bf16.msra.mxu0 %v440_v15 }
  0x58   :  { %188 = vmatprep.subr.bf16.mxu0 %v531_v1 }
  0x59   :  { %418 = vmatpush3.bf16.msra.mxu1 %v453_v22 }
  0x5b   :  { %189 = vmatpush1.bf16.msra.mxu0 %v441_v17 }
  0x5c   :  { %190 = vmatprep.subr.bf16.mxu0 %v531_v1 }
  0x5f   :  { %191 = vmatpush1.bf16.msra.mxu0 %v442_v19 }
  0x62   :  { %205 = vmatmul.mubr.bf16.vlgmr.msra.gmra.mrb[0].mxu0 %v443_v20 }
 0x135   :  { %v206_v24 = vpop.f32.mrb[0].mxu0 }
 0x136   :  { %v207_v25 = vadd.f32 %v369_v23, %v206_v24  ;;  %v208_v26 = vpop.f32.mrb[1].mxu0 }
 0x137   :  { %v209_v27 = vpop.f32.mrb[2].mxu0 }
 0x138   :  { %v215_v28 = vmul.f32 0.2, %v207_v25  ;;  %v210_v29 = vadd.f32 %v369_v23, %v209_v27  ;;  %v211_v30 = vpop.f32.mrb[3].mxu0  ;;  %vm213_vm2 = vcmp.gt.f32.partialorder %v207_v25, 0.0 }
 0x13a   :  { %vm214_vm3 = vcmp.gt.f32.partialorder %v210_v29, 0.0  ;;  %v216_v31 = vmul.f32 0.2, %v210_v29  ;;  %v217_v32 = vsel %vm213_vm2, %v207_v25, %v215_v28 }
 0x13c   :  { %v218_v33 = vsel %vm214_vm3, %v210_v29, %v216_v31 }
 0x13d   :  { %v219_v34 = vpack.c.bf16 %v218_v33, %v217_v32 }
 0x13f   :  { %420 = vmatmul.mubr.bf16.vlgmr.msra.gmra.mrb[0].mxu1 %v219_v34 }
 0x212   :  { %v325_v36 = vpop.f32.mrb[0].mxu1 }
 0x213   :  { %v326_v37 = vadd.f32 %v383_v35, %v325_v36  ;;  %v421_v38 = vpop.f32.mrb[1].mxu1 }
 0x214   :  { %v328_v39 = vpop.f32.mrb[2].mxu1 }
 0x215   :  { %v334_v40 = vmul.f32 0.2, %v326_v37  ;;  %v329_v41 = vadd.f32 %v383_v35, %v328_v39  ;;  %v422_v42 = vpop.f32.mrb[3].mxu1  ;;  %vm332_vm4 = vcmp.gt.f32.partialorder %v326_v37, 0.0 }
 0x217   :  { %v335_v44 = vmul.f32 0.2, %v329_v41  ;;  %v336_v45 = vsel %vm332_vm4, %v326_v37, %v334_v40  ;;  %vm333_vm5 = vcmp.gt.f32.partialorder %v329_v41, 0.0 }
 0x218   :  { %v345_v46 = vmul.f32 %v392_v43, %v336_v45 }
 0x219   :  { %v337_v47 = vsel %vm333_vm5, %v329_v41, %v335_v44 }
 0x21a   :  { %347 = vadd.xlane.f32.xlu0 %v345_v46  ;;  %v346_v48 = vmul.f32 %v392_v43, %v337_v47 }
 0x21e   :  { %349 = vadd.xlane.f32.xlu0 %v346_v48 }
 0x2a7   :  { %v348_v50 = vpop.xlane.xlu0 %347 }
 0x2a8   :  { %v358_v51 = vadd.f32 %v393_v49, %v348_v50 }
 0x2aa   :  { %361 = vst.msk [vmem:[%s641_s7] sm:$0xff] %vm360_vm6, %v358_v51 }
 0x2ab   :  { %v350_v52 = vpop.xlane.xlu0 %349 }
 0x2ac   :  { %v359_v53 = vadd.f32 %v393_v49, %v350_v52 }
 0x2ae   :  { %362 = vst.msk [vmem:[%s641_s7 + $0x8] sm:$0xff] %vm360_vm6, %v359_v53 }
 0x2af   :  { %367 = vsyncpa [#allocation4], 1 }
 0x2b0   :  { %368 = vsyncpa [#allocation6], 1 }

</bundles_post_ra>
